<compile_context>
chip_gen: v7x
topology: tpu7x:2x2x1
jax: 0.10.0
libtpu: 0.0.40
codegen_flags: <defaults>
</compile_context>

<pallas_src>
import math

import jax
import jax.numpy as jnp
from jax.experimental import pallas as pl
from jax.experimental.pallas import tpu as pltpu


def ese_kernel(x_ref, wt_ref, b_ref, o_ref, acc_ref):
    # x_ref:  (tb, C, thw)  streamed activation tile
    # wt_ref: (C, C)        pre-transposed weight with 1/HW folded in (resident)
    # b_ref:  (1, C)        bias (resident)
    # o_ref:  (tb, C)       output tile (resident across the HW axis)
    # acc_ref:(tb, C) f32   running spatial sum (VMEM scratch)
    hw_step = pl.program_id(1)

    @pl.when(hw_step == 0)
    def _init():
        acc_ref[...] = jnp.zeros_like(acc_ref)

    # Spatial partial sum for this HW tile.  The kernel is DMA-bound, so this
    # cross-lane reduce (XLU slot) is hidden under the next block's DMA.
    acc_ref[...] += jnp.sum(x_ref[...], axis=-1)

    @pl.when(hw_step == pl.num_programs(1) - 1)
    def _finalize():
        # 1/HW is folded into wt, so acc_sum @ wt == mean(x) @ W.T
        y = jnp.dot(acc_ref[...], wt_ref[...], preferred_element_type=jnp.float32)
        y = y + b_ref[...]
        o_ref[...] = jax.nn.sigmoid(y).astype(o_ref.dtype)


def _pick_tile(total, cap, mult):
    """Largest tile <= cap that either equals `total` or is a multiple of
    `mult` and evenly divides `total`.  Falls back to `total` (no tiling)."""
    if total <= cap:
        return total
    t = (cap // mult) * mult
    while t >= mult:
        if total % t == 0:
            return t
        t -= mult
    return total


def _choose_tiles(b, c, hw, budget_bytes):
    elem = 4  # f32
    if b * c * hw * elem <= budget_bytes:
        return b, hw                      # whole thing fits one block
    # Tile the spatial axis first (dominant extent), then the batch axis.
    thw = _pick_tile(hw, max(128, budget_bytes // (c * elem)), 128)
    tb_cap = max(1, budget_bytes // (c * thw * elem))
    tb = _pick_tile(b, tb_cap, 8)
    return tb, thw


def ese_forward(x, weight, bias, *, x_block_bytes=4 * 1024 * 1024):
    """x: (B, C, H, W) f32; weight: (C, C) (PyTorch out x in); bias: (C,).
    Returns sigmoid(avgpool(x) @ W.T + b) with shape (B, C, 1, 1)."""
    b, c, h, w = x.shape
    hw = h * w
    x3 = x.reshape(b, c, hw)

    # Host-side prep: pre-transpose weight, fold the 1/HW pooling scale in.
    wt = (weight.T / float(hw)).astype(jnp.float32)     # (C_in, C_out)
    bias2 = bias.reshape(1, c).astype(jnp.float32)

    tb, thw = _choose_tiles(b, c, hw, x_block_bytes)
    grid = (pl.cdiv(b, tb), pl.cdiv(hw, thw))

    cost = pl.CostEstimate(
        flops=2 * b * c * c + b * c * hw,
        transcendentals=b * c,
        bytes_accessed=b * c * hw * 4 + c * c * 4 + c * 4 + b * c * 4,
    )

    out = pl.pallas_call(
        ese_kernel,
        out_shape=jax.ShapeDtypeStruct((b, c), jnp.float32),
        grid_spec=pltpu.PrefetchScalarGridSpec(
            num_scalar_prefetch=0,
            grid=grid,
            in_specs=[
                pl.BlockSpec((tb, c, thw), lambda i, j: (i, 0, j)),  # streamed x
                pl.BlockSpec((c, c), lambda i, j: (0, 0)),           # resident Wt
                pl.BlockSpec((1, c), lambda i, j: (0, 0)),           # resident bias
            ],
            out_specs=pl.BlockSpec((tb, c), lambda i, j: (i, 0)),
            scratch_shapes=[pltpu.VMEM((tb, c), jnp.float32)],
        ),
        compiler_params=pltpu.CompilerParams(
            dimension_semantics=("parallel", "arbitrary"),
            vmem_limit_bytes=32 * 1024 * 1024,
        ),
        cost_estimate=cost,
    )(x3, wt, bias2)

    return out.reshape(b, c, 1, 1)


def init_params(channel, key):
    """Deterministic init mimicking nn.Linear default (uniform +/- 1/sqrt(fan_in))."""
    k_w, k_b = jax.random.split(key)
    bound = 1.0 / math.sqrt(channel)
    weight = jax.random.uniform(k_w, (channel, channel), jnp.float32, -bound, bound)
    bias = jax.random.uniform(k_b, (channel,), jnp.float32, -bound, bound)
    return weight, bias


def ese_reference(x, weight, bias):
    """Pure-JAX reference for sanity checking."""
    pooled = jnp.mean(x, axis=(2, 3))                 # (B, C)
    y = pooled @ weight.T + bias                      # (B, C)
    return jax.nn.sigmoid(y)[:, :, None, None]        # (B, C, 1, 1)


if __name__ == "__main__":
    key = jax.random.PRNGKey(0)
    k_x, k_p = jax.random.split(key)

    B, C, H, W = 2, 4, 16, 16
    x = jax.random.normal(k_x, (B, C, H, W), jnp.float32)
    weight, bias = init_params(C, k_p)

    out = jax.block_until_ready(ese_forward(x, weight, bias))
    ref = ese_reference(x, weight, bias)

    assert out.shape == (B, C, 1, 1)
    assert jnp.allclose(out, ref, atol=1e-5, rtol=1e-5), float(
        jnp.max(jnp.abs(out - ref))
    )

    print("KERNEL_OK")
</pallas_src>

<mosaic_0001>
module attributes {stable_mosaic.version = 11 : i64} {
  func.func @ese_kernel(%arg0: i32, %arg1: i32, %arg2: memref<2x4x256xf32, #tpu.memory_space<vmem>>, %arg3: memref<4x4xf32, #tpu.memory_space<vmem>>, %arg4: memref<1x4xf32, #tpu.memory_space<vmem>>, %arg5: memref<2x4xf32, #tpu.memory_space<vmem>>, %arg6: memref<2x4xf32, #tpu.memory_space<vmem>>) attributes {dimension_semantics = [#tpu.dimension_semantics<parallel>, #tpu.dimension_semantics<arbitrary>], iteration_bounds = array<i64: 1, 1>, scalar_prefetch = 0 : i64, scratch_operands = 1 : i64, tpu.core_type = #tpu.core_type<tc>, window_params = [{transform_indices = @transform_0, window_bounds = array<i64: 2, 4, 256>}, {pipeline_mode = #tpu.pipeline_mode<synchronous>, transform_indices = @transform_1, window_bounds = array<i64: 4, 4>}, {pipeline_mode = #tpu.pipeline_mode<synchronous>, transform_indices = @transform_2, window_bounds = array<i64: 1, 4>}, {transform_indices = @transform_3, window_bounds = array<i64: 2, 4>}]} {
    %c0_i32 = arith.constant 0 : i32
    %0 = arith.cmpi eq, %arg1, %c0_i32 : i32
    %1 = arith.extui %0 : i1 to i32
    %c0_i32_0 = arith.constant 0 : i32
    %2 = arith.cmpi ne, %1, %c0_i32_0 : i32
    scf.if %2 {
      %cst_9 = arith.constant 0.000000e+00 : f32
      %11 = vector.broadcast %cst_9 : f32 to vector<2x4xf32>
      %c0_10 = arith.constant 0 : index
      %c0_11 = arith.constant 0 : index
      %12 = vector.load %arg6[%c0_10, %c0_11] : memref<2x4xf32, #tpu.memory_space<vmem>>, vector<2x4xf32>
      tpu.vector_store %arg6[%c0_10, %c0_11], %11 {strides = array<i32>} : memref<2x4xf32, #tpu.memory_space<vmem>>, vector<2x4xf32>,
    } else {
    }
    %c0 = arith.constant 0 : index
    %c0_1 = arith.constant 0 : index
    %3 = vector.load %arg6[%c0, %c0_1] : memref<2x4xf32, #tpu.memory_space<vmem>>, vector<2x4xf32>
    %c0_2 = arith.constant 0 : index
    %c0_3 = arith.constant 0 : index
    %c0_4 = arith.constant 0 : index
    %4 = vector.load %arg2[%c0_2, %c0_3, %c0_4] : memref<2x4x256xf32, #tpu.memory_space<vmem>>, vector<2x4x256xf32>
    %cst = arith.constant dense<0.000000e+00> : vector<2x4xf32>
    %5 = vector.multi_reduction <add>, %4, %cst [2] : vector<2x4x256xf32> to vector<2x4xf32>
    %6 = arith.addf %3, %5 : vector<2x4xf32>
    %c0_5 = arith.constant 0 : index
    %c0_6 = arith.constant 0 : index
    %7 = vector.load %arg6[%c0_5, %c0_6] : memref<2x4xf32, #tpu.memory_space<vmem>>, vector<2x4xf32>
    tpu.vector_store %arg6[%c0_5, %c0_6], %6 {strides = array<i32>} : memref<2x4xf32, #tpu.memory_space<vmem>>, vector<2x4xf32>,
    %c0_i32_7 = arith.constant 0 : i32
    %8 = arith.cmpi eq, %arg1, %c0_i32_7 : i32
    %9 = arith.extui %8 : i1 to i32
    %c0_i32_8 = arith.constant 0 : i32
    %10 = arith.cmpi ne, %9, %c0_i32_8 : i32
    scf.if %10 {
      %c0_9 = arith.constant 0 : index
      %c0_10 = arith.constant 0 : index
      %11 = vector.load %arg6[%c0_9, %c0_10] : memref<2x4xf32, #tpu.memory_space<vmem>>, vector<2x4xf32>
      %c0_11 = arith.constant 0 : index
      %c0_12 = arith.constant 0 : index
      %12 = vector.load %arg3[%c0_11, %c0_12] : memref<4x4xf32, #tpu.memory_space<vmem>>, vector<4x4xf32>
      %cst_13 = arith.constant dense<0.000000e+00> : vector<2x4xf32>
      %13 = tpu.matmul %11, %12, %cst_13 {dimension_numbers = #tpu.dot_dimension_numbers<[1], [0], [0], [1], [0, 0, 1, 1], [], []>} : vector<2x4xf32>, vector<4x4xf32>, vector<2x4xf32> -> vector<2x4xf32>
      %c0_14 = arith.constant 0 : index
      %c0_15 = arith.constant 0 : index
      %14 = vector.load %arg4[%c0_14, %c0_15] : memref<1x4xf32, #tpu.memory_space<vmem>>, vector<1x4xf32>
      %15 = vector.broadcast %14 : vector<1x4xf32> to vector<2x4xf32>
      %16 = arith.addf %13, %15 : vector<2x4xf32>
      %17 = arith.negf %16 : vector<2x4xf32>
      %18 = math.exp %17 : vector<2x4xf32>
      %cst_16 = arith.constant 1.000000e+00 : f32
      %19 = vector.broadcast %cst_16 : f32 to vector<2x4xf32>
      %20 = arith.addf %19, %18 : vector<2x4xf32>
      %21 = arith.divf %19, %20 : vector<2x4xf32>
      %c0_17 = arith.constant 0 : index
      %c0_18 = arith.constant 0 : index
      %22 = vector.load %arg5[%c0_17, %c0_18] : memref<2x4xf32, #tpu.memory_space<vmem>>, vector<2x4xf32>
      tpu.vector_store %arg5[%c0_17, %c0_18], %21 {strides = array<i32>} : memref<2x4xf32, #tpu.memory_space<vmem>>, vector<2x4xf32>,
    } else {
    }
    return
  }
  func.func @transform_0(%arg0: i32, %arg1: i32) -> (i32, i32, i32) {
    %c0_i32 = arith.constant 0 : i32
    %c0_i32_0 = arith.constant 0 : i32
    return %arg0, %c0_i32, %arg1 : i32, i32, i32
  }
  func.func @transform_1(%arg0: i32, %arg1: i32) -> (i32, i32) {
    %c0_i32 = arith.constant 0 : i32
    %c0_i32_0 = arith.constant 0 : i32
    %c0_i32_1 = arith.constant 0 : i32
    return %c0_i32, %c0_i32_0 : i32, i32
  }
  func.func @transform_2(%arg0: i32, %arg1: i32) -> (i32, i32) {
    %c0_i32 = arith.constant 0 : i32
    %c0_i32_0 = arith.constant 0 : i32
    %c0_i32_1 = arith.constant 0 : i32
    return %c0_i32, %c0_i32_0 : i32, i32
  }
  func.func @transform_3(%arg0: i32, %arg1: i32) -> (i32, i32) {
    %c0_i32 = arith.constant 0 : i32
    %c0_i32_0 = arith.constant 0 : i32
    return %arg0, %c0_i32 : i32, i32
  }
}

</mosaic_0001>

<bundles_post_ra>
// kernel: tpu_custom_call.1
= control target key start
LH: loop header
LB: loop body
LE: loop exit
PB: predicated region body
PF: predicated region fallthrough
CT: control target
= control target key end

     0   :  { %8 = vsyncpa [#allocation4], 0  ;;  %s367_s0 = inlined_call_operand.hbm [shape: f32[2,4,256], index: 0, kind: input, shape index: {}]   ;;  %s368_s1 = inlined_call_operand.hbm [shape: f32[4,4], index: 1, kind: input, shape index: {}]   ;;  %s369_s2 = inlined_call_operand.vmem [shape: f32[1,4], index: 2, kind: input, shape index: {}]   ;;  %s370_s3 = inlined_call_operand.hbm [shape: f32[2,4], index: 3, kind: output, shape index: {}]  }
   0x1   :  { %9 = vsyncpa [#allocation7], 0 }
   0x2   :  { %10 = vsyncpa [#allocation5], 0  ;;  %s293_s12 = smov [#allocation3]   ;;  %s221_s16 = scalar_lea.hbm %s367_s0, 256 }
   0x3   :  { %s16_s13 = sshll.u32 %s293_s12, 4  ;;  %p222_p0 = scmp.ne.s32.totalorder %s367_s0, %s221_s16  ;;  %s17_s13 = int_to_ptr.vmem [resolvable:$true] %s16_s13 }
   0x4   :  { %p225_p1 = scmp.lt.u32.totalorder %s221_s16, %s367_s0 }
   0x6   :  { %p227_p2 = pnand %p225_p1, %p222_p0 }
   0x8   :  { %230 = shalt.err (!%p227_p2)
}
   0x9   :  { %s231_s21 = scalar_lea.vmem %s17_s13, 256  ;;  %p236_p4 = scmp.lt.s32.totalorder %s17_s13, %s17_s13 }
   0xa   :  { %p232_p3 = scmp.ne.s32.totalorder %s17_s13, %s231_s21  ;;  %p237_p5 = scmp.lt.s32.totalorder %s231_s21, %s231_s21 }
   0xc   :  { %p238_p6 = por %p237_p5, %p236_p4 }
   0xe   :  { %p239_p7 = pnand %p238_p6, %p232_p3 }
  0x10   :  { %242 = shalt.err (!%p239_p7)
}
  0x11   :  { %s294_s22 = smov 128   ;;  %s295_s23 = smov 8  }
  0x12   :  { %22 = dma.hbm_to_vmem [thread:$0]  %s367_s0, 256, %s17_s13, [#allocation4], %s294_s22, %s294_s22, %s295_s23  }
  0x13   :  { %s296_s26 = smov [#allocation6]   ;;  %s243_s30 = scalar_lea.hbm %s368_s1, 64 }
  0x14   :  { %s29_s27 = sshll.u32 %s296_s26, 4  ;;  %p244_p8 = scmp.ne.s32.totalorder %s368_s1, %s243_s30  ;;  %s30_s27 = int_to_ptr.vmem [resolvable:$true] %s29_s27 }
  0x15   :  { %p247_p9 = scmp.lt.u32.totalorder %s243_s30, %s368_s1 }
  0x17   :  { %p249_p10 = pnand %p247_p9, %p244_p8 }
  0x19   :  { %252 = shalt.err (!%p249_p10)
}
  0x1a   :  { %s253_s8 = scalar_lea.vmem %s30_s27, 64  ;;  %p258_p12 = scmp.lt.s32.totalorder %s30_s27, %s30_s27 }
  0x1b   :  { %p254_p11 = scmp.ne.s32.totalorder %s30_s27, %s253_s8  ;;  %p259_p13 = scmp.lt.s32.totalorder %s253_s8, %s253_s8 }
  0x1d   :  { %p260_p0 = por %p259_p13, %p258_p12 }
  0x1f   :  { %p261_p1 = pnand %p260_p0, %p254_p11 }
  0x21   :  { %264 = shalt.err (!%p261_p1)
}
  0x22   :  { %32 = dma.hbm_to_vmem [thread:$0]  %s368_s1, 64, %s30_s27, [#allocation7]  }
  0x23   :  { %287 = dma.done.wait [#allocation4], 256  }
  0x24   :  { %288 = vsyncadd [#allocation4], 4294967040 }
  0x25   :  { %289 = dma.done.wait [#allocation7], 64  }
  0x26   :  { %290 = vsyncadd [#allocation7], 4294967232  ;;  %vm56_vm0 = vcmask 1043456   ;;  %v48_v0 = vld [vmem:[#allocation3] sm:$0xff]  ;;  %v49_v1 = vld [vmem:[#allocation3 + $0x8] sm:$0xff]  ;;  %vm45_vm1 = vcmask 25600   ;;  %v69_v12 = vlaneseq }
  0x27   :  { %v52_v2 = vcombine.high %v48_v0, %v48_v0  ;;  %v57_v3 = vsel %vm56_vm0, %v48_v0, 0.0  ;;  %v53_v4 = vcombine.high %v49_v1, %v49_v1  ;;  %v62_v6 = vsel %vm56_vm0, %v49_v1, 0.0  ;;  %v89_v11 = vld [vmem:[#allocation6] sm:$0xf]  ;;  %v197_v24 = vld [vmem:[%s369_s2] ss:$0 sm:$0xff] }
  0x28   :  { %v297_v10 = vmov 0.0   ;;  %vm298_vm2 = vmmov 0   ;;  %v70_v13 = vand.u32 127, %v69_v12  ;;  %v72_v14 = vshrl.u32 %v69_v12, 7  ;;  %s299_s11 = smov [#allocation8]  }
  0x29   :  { %v58_v5 = vsel %vm56_vm0, %v52_v2, 0.0  ;;  %v63_v7 = vsel %vm56_vm0, %v53_v4, 0.0  ;;  %46 = vst.msk [vmem:[#allocation2] sm:$0x3] %vm45_vm1, %v297_v10  ;;  %203 = vmatprep.subr.mxu0 %v297_v10  ;;  %205 = vmatprep.mubr.msk.f32.mxu0 %vm298_vm2, %v297_v10  ;;  %vm79_vm3 = vcmask 1041409   ;;  %vm97_vm4 = vcmask 31744  }
  0x2a   :  { %v59_v8 = vadd.f32 %v58_v5, %v57_v3  ;;  %v64_v9 = vadd.f32 %v63_v7, %v62_v6  ;;  %204 = vmatpush3.msk.msra.mxu0 %vm56_vm0, %v89_v11  ;;  %v73_v16 = vsub.s32 %v70_v13, %v72_v14  ;;  %s187_s12 = sshll.u32 %s299_s11, 4  ;;  %s188_s12 = int_to_ptr.vmem [resolvable:$true] %s187_s12 }
  0x2b   :  { %s265_s13 = scalar_lea.vmem %s188_s12, 32  ;;  %p270_p3 = scmp.lt.s32.totalorder %s188_s12, %s188_s12 }
  0x2c   :  { %60 = vadd.xlane.f32.xlu0 %v59_v8  ;;  %p266_p2 = scmp.ne.s32.totalorder %s188_s12, %s265_s13  ;;  %p271_p4 = scmp.lt.s32.totalorder %s265_s13, %s265_s13 }
  0x2e   :  { %p272_p5 = por %p271_p4, %p270_p3 }
  0x30   :  { %65 = vadd.xlane.f32.xlu0 %v64_v9  ;;  %v47_v20 = vld [vmem:[#allocation2] sm:$0x3]  ;;  %p273_p6 = pnand %p272_p5, %p266_p2 }
  0xb9   :  { %v61_v15 = vpop.xlane.xlu0 %60 }
  0xba   :  { %v74_v18 = vrot.slane %v61_v15, %v73_v16 }
  0xbd   :  { %v66_v17 = vpop.xlane.xlu0 %65 }
  0xbe   :  { %v78_v19 = vrot.slane %v66_v17, %v73_v16 }
  0xc0   :  { %v80_v21 = vsel %vm79_vm3, %v78_v19, %v74_v18 }
  0xc1   :  { %v82_v22 = vadd.f32 %v80_v21, %v47_v20 }
  0xc3   :  { %84 = vst.msk [vmem:[#allocation2] sm:$0x3] %vm45_vm1, %v82_v22 }
  0xca   :  { %v88_v23 = vld [vmem:[#allocation2] sm:$0x3] }
  0xcb   :  { %206 = vmatmul.mubr.msk.f32.vlgmr.msra.gmra.mrb[0].mxu0 %vm97_vm4, %v88_v23 }
 0x19e   :  { %v170_v25 = vpop.f32.mrb[0].mxu0 }
 0x19f   :  { %v171_v26 = vadd.f32 %v197_v24, %v170_v25  ;;  %v207_v27 = vpop.f32.mrb[1].mxu0 }
 0x1a1   :  { %v200_v28 = vmul.f32 -1.442695, %v171_v26 }
 0x1a3   :  { %217 = vpow2.f32 %v200_v28 }
 0x1ad   :  { %v218_v29 = vpop.eup %217 }
 0x1ae   :  { %v177_v30 = vadd.f32 1.0, %v218_v29 }
 0x1b0   :  { %219 = vrcp.f32 %v177_v30 }
 0x1ba   :  { %v220_v31 = vpop.eup %219 }
 0x1bb   :  { %180 = vst.msk [vmem:[#allocation8] sm:$0x3] %vm45_vm1, %v220_v31 }
 0x1bc   :  { %276 = shalt.err (!%p273_p6)
}
 0x1bd   :  { %s277_s15 = scalar_lea.hbm %s370_s3, 32 }
 0x1be   :  { %p278_p7 = scmp.ne.s32.totalorder %s370_s3, %s277_s15  ;;  %p281_p8 = scmp.lt.u32.totalorder %s277_s15, %s370_s3 }
 0x1c0   :  { %p283_p9 = pnand %p281_p8, %p278_p7 }
 0x1c2   :  { %286 = shalt.err (!%p283_p9)
}
 0x1c3   :  { %190 = dma.vmem_to_hbm [thread:$0]  %s188_s12, 32, %s370_s3, [#allocation5]  }
 0x1c4   :  { %291 = dma.done.wait [#allocation5], 32  }
 0x1c5   :  { %292 = vsyncadd [#allocation5], 4294967264 }
 0x1c6   :  { %194 = vsyncpa [#allocation4], 1 }
 0x1c7   :  { %195 = vsyncpa [#allocation7], 1 }
 0x1c8   :  { %196 = vsyncpa [#allocation5], 1 }

</bundles_post_ra>
